<compile_context>
chip_gen: v7x
topology: tpu7x:2x2x1
jax: 0.10.0
libtpu: 0.0.40
codegen_flags: <defaults>
</compile_context>

<pallas_src>
import jax
import jax.numpy as jnp
from jax.experimental import pallas as pl
from jax.experimental.pallas import tpu as pltpu

LANE = 128            # TPU lane width (hidden dim padded to this for a
                      # lane-dense intermediate `h`)
DEFAULT_TILE_B = 2048  # rows of `state` per grid step (multiple of 8); any
                       # batch <= this runs as a single grid step


def _round_up(n, m):
    return ((n + m - 1) // m) * m


def _mlp_kernel(x_ref, w1_ref, b1_ref, w2_ref, b2_ref, out_ref):
    # x:  (tb, D_in)        w1: (D_in, H_pad)   b1: (1, H_pad)
    # w2: (H_pad, D_out)    b2: (1, D_out)      out: (tb, D_out)
    x = x_ref[...]

    # fc1 + bias + ReLU. Padded H lanes: w1/b1 columns are zero -> h stays 0
    # there, so they contribute nothing to the fc2 contraction.
    h = jnp.dot(x, w1_ref[...], preferred_element_type=jnp.float32)
    h = jnp.maximum(h + b1_ref[...], 0.0)

    # fc2 + bias -> only the real out_actions lanes are computed and stored.
    q = jnp.dot(h, w2_ref[...], preferred_element_type=jnp.float32)
    out_ref[...] = (q + b2_ref[...]).astype(out_ref.dtype)
    # NOTE: no reduction over the batch (sublane) axis anywhere above -- this
    # is what makes the partial trailing batch block (garbage OOB rows) safe.


def prepare_params(w1, b1, w2, b2):
    """One-time parameter prep (call at init, NOT per forward).

    Takes PyTorch nn.Linear layout:
      w1: (H, D_in), b1: (H,), w2: (D_out, H), b2: (D_out,)
    Returns (in, out)-layout f32 weights:
      w1_p: (D_in, H_pad)  b1_p: (1, H_pad)   -- H zero-padded to 128 lanes
      w2_p: (H_pad, D_out) b2_p: (1, D_out)   -- output kept at real D_out
    """
    w1 = jnp.asarray(w1, jnp.float32)
    b1 = jnp.asarray(b1, jnp.float32)
    w2 = jnp.asarray(w2, jnp.float32)
    b2 = jnp.asarray(b2, jnp.float32)

    H, d_in = w1.shape
    d_out = w2.shape[0]
    H_pad = _round_up(H, LANE)

    w1_p = jnp.zeros((d_in, H_pad), jnp.float32).at[:, :H].set(w1.T)
    b1_p = jnp.zeros((1, H_pad), jnp.float32).at[:, :H].set(b1)
    w2_p = jnp.zeros((H_pad, d_out), jnp.float32).at[:H, :].set(w2.T)
    b2_p = b2.reshape(1, d_out)
    return w1_p, b1_p, w2_p, b2_p


def network_forward(state, params, tile_b=DEFAULT_TILE_B):
    """Fused Linear -> ReLU -> Linear over a 1-D batch grid.

    state:  (B, D_in) float32
    params: output of prepare_params()
    returns (B, out_actions) float32
    """
    w1_p, b1_p, w2_p, b2_p = params
    state = jnp.asarray(state, jnp.float32)
    B, d_in = state.shape
    H_pad = w1_p.shape[1]
    d_out = w2_p.shape[1]

    # Batch tile: forced multiple of 8 sublanes, capped at the (8-rounded)
    # batch so small batches run as a single grid step.
    tb = min(_round_up(tile_b, 8), _round_up(B, 8))
    steps = pl.cdiv(B, tb)

    out = pl.pallas_call(
        _mlp_kernel,
        out_shape=jax.ShapeDtypeStruct((B, d_out), jnp.float32),
        grid=(steps,),
        in_specs=[
            pl.BlockSpec((tb, d_in), lambda i: (i, 0)),      # state tile
            pl.BlockSpec((d_in, H_pad), lambda i: (0, 0)),   # resident fc1 W
            pl.BlockSpec((1, H_pad), lambda i: (0, 0)),      # resident fc1 b
            pl.BlockSpec((H_pad, d_out), lambda i: (0, 0)),  # resident fc2 W
            pl.BlockSpec((1, d_out), lambda i: (0, 0)),      # resident fc2 b
        ],
        out_specs=pl.BlockSpec((tb, d_out), lambda i: (i, 0)),
        compiler_params=pltpu.CompilerParams(
            # "parallel" vs "arbitrary" is codegen-identical; for huge B on
            # v7x, pltpu.CORE_PARALLEL on this axis would engage both TCs.
            dimension_semantics=("arbitrary",)),
    )(state, w1_p, b1_p, w2_p, b2_p)

    return out


def _reference_forward(state, w1, b1, w2, b2):
    h = jnp.maximum(state @ w1.T + b1, 0.0)
    return h @ w2.T + b2


if __name__ == "__main__":
    # Module hyperparameters (DQN-style MLP).
    batch = 512
    input_size = 16
    hl_size = 30
    out_actions = 4

    key = jax.random.PRNGKey(0)
    k_x, k_w1, k_b1, k_w2, k_b2 = jax.random.split(key, 5)

    state = jax.random.normal(k_x, (batch, input_size), dtype=jnp.float32)

    # Deterministic synthetic parameters (PyTorch nn.Linear layout: (out, in)).
    w1 = jax.random.normal(k_w1, (hl_size, input_size), dtype=jnp.float32) * 0.1
    b1 = jax.random.normal(k_b1, (hl_size,), dtype=jnp.float32) * 0.1
    w2 = jax.random.normal(k_w2, (out_actions, hl_size), dtype=jnp.float32) * 0.1
    b2 = jax.random.normal(k_b2, (out_actions,), dtype=jnp.float32) * 0.1

    ref = _reference_forward(state, w1, b1, w2, b2)

    # One-time parameter prep, then a jitted forward over prepared params.
    params = prepare_params(w1, b1, w2, b2)

    # Default config: batch <= DEFAULT_TILE_B -> single grid step.
    fwd = jax.jit(lambda s: network_forward(s, params))
    qvals = fwd(state)
    jax.block_until_ready(qvals)
    assert qvals.shape == (batch, out_actions)
    assert jnp.allclose(qvals, ref, atol=1e-4, rtol=1e-4), "mismatch (grid=1)"

    # Also exercise the multi-step grid path (4 steps of 128 rows).
    fwd_tiled = jax.jit(lambda s: network_forward(s, params, tile_b=128))
    qvals_tiled = fwd_tiled(state)
    jax.block_until_ready(qvals_tiled)
    assert jnp.allclose(qvals_tiled, ref, atol=1e-4, rtol=1e-4), \
        "mismatch (grid=4)"

    print("KERNEL_OK")
</pallas_src>

<mosaic_0001>
module attributes {stable_mosaic.version = 11 : i64} {
  func.func @_mlp_kernel(%arg0: i32, %arg1: memref<512x16xf32, #tpu.memory_space<vmem>>, %arg2: memref<16x128xf32, #tpu.memory_space<vmem>>, %arg3: memref<1x128xf32, #tpu.memory_space<vmem>>, %arg4: memref<128x4xf32, #tpu.memory_space<vmem>>, %arg5: memref<1x4xf32, #tpu.memory_space<vmem>>, %arg6: memref<512x4xf32, #tpu.memory_space<vmem>>) attributes {dimension_semantics = [#tpu.dimension_semantics<arbitrary>], iteration_bounds = array<i64: 1>, scalar_prefetch = 0 : i64, scratch_operands = 0 : i64, tpu.core_type = #tpu.core_type<tc>, window_params = [{transform_indices = @transform_0, window_bounds = array<i64: 512, 16>}, {pipeline_mode = #tpu.pipeline_mode<synchronous>, transform_indices = @transform_1, window_bounds = array<i64: 16, 128>}, {pipeline_mode = #tpu.pipeline_mode<synchronous>, transform_indices = @transform_2, window_bounds = array<i64: 1, 128>}, {pipeline_mode = #tpu.pipeline_mode<synchronous>, transform_indices = @transform_3, window_bounds = array<i64: 128, 4>}, {pipeline_mode = #tpu.pipeline_mode<synchronous>, transform_indices = @transform_4, window_bounds = array<i64: 1, 4>}, {transform_indices = @transform_5, window_bounds = array<i64: 512, 4>}]} {
    %c0 = arith.constant 0 : index
    %c0_0 = arith.constant 0 : index
    %0 = vector.load %arg1[%c0, %c0_0] : memref<512x16xf32, #tpu.memory_space<vmem>>, vector<512x16xf32>
    %c0_1 = arith.constant 0 : index
    %c0_2 = arith.constant 0 : index
    %1 = vector.load %arg2[%c0_1, %c0_2] : memref<16x128xf32, #tpu.memory_space<vmem>>, vector<16x128xf32>
    %cst = arith.constant dense<0.000000e+00> : vector<512x128xf32>
    %2 = tpu.matmul %0, %1, %cst {dimension_numbers = #tpu.dot_dimension_numbers<[1], [0], [0], [1], [0, 0, 1, 1], [], []>} : vector<512x16xf32>, vector<16x128xf32>, vector<512x128xf32> -> vector<512x128xf32>
    %c0_3 = arith.constant 0 : index
    %c0_4 = arith.constant 0 : index
    %3 = vector.load %arg3[%c0_3, %c0_4] : memref<1x128xf32, #tpu.memory_space<vmem>>, vector<1x128xf32>
    %4 = vector.broadcast %3 : vector<1x128xf32> to vector<512x128xf32>
    %5 = arith.addf %2, %4 : vector<512x128xf32>
    %cst_5 = arith.constant 0.000000e+00 : f32
    %6 = vector.broadcast %cst_5 : f32 to vector<512x128xf32>
    %7 = arith.maximumf %5, %6 : vector<512x128xf32>
    %c0_6 = arith.constant 0 : index
    %c0_7 = arith.constant 0 : index
    %8 = vector.load %arg4[%c0_6, %c0_7] : memref<128x4xf32, #tpu.memory_space<vmem>>, vector<128x4xf32>
    %cst_8 = arith.constant dense<0.000000e+00> : vector<512x4xf32>
    %9 = tpu.matmul %7, %8, %cst_8 {dimension_numbers = #tpu.dot_dimension_numbers<[1], [0], [0], [1], [0, 0, 1, 1], [], []>} : vector<512x128xf32>, vector<128x4xf32>, vector<512x4xf32> -> vector<512x4xf32>
    %c0_9 = arith.constant 0 : index
    %c0_10 = arith.constant 0 : index
    %10 = vector.load %arg5[%c0_9, %c0_10] : memref<1x4xf32, #tpu.memory_space<vmem>>, vector<1x4xf32>
    %11 = vector.broadcast %10 : vector<1x4xf32> to vector<512x4xf32>
    %12 = arith.addf %9, %11 : vector<512x4xf32>
    %c0_11 = arith.constant 0 : index
    %c0_12 = arith.constant 0 : index
    %13 = vector.load %arg6[%c0_11, %c0_12] : memref<512x4xf32, #tpu.memory_space<vmem>>, vector<512x4xf32>
    tpu.vector_store %arg6[%c0_11, %c0_12], %12 {strides = array<i32>} : memref<512x4xf32, #tpu.memory_space<vmem>>, vector<512x4xf32>,
    return
  }
  func.func @transform_0(%arg0: i32) -> (i32, i32) {
    %c0_i32 = arith.constant 0 : i32
    %c0_i32_0 = arith.constant 0 : i32
    return %arg0, %c0_i32 : i32, i32
  }
  func.func @transform_1(%arg0: i32) -> (i32, i32) {
    %c0_i32 = arith.constant 0 : i32
    %c0_i32_0 = arith.constant 0 : i32
    %c0_i32_1 = arith.constant 0 : i32
    return %c0_i32, %c0_i32_0 : i32, i32
  }
  func.func @transform_2(%arg0: i32) -> (i32, i32) {
    %c0_i32 = arith.constant 0 : i32
    %c0_i32_0 = arith.constant 0 : i32
    %c0_i32_1 = arith.constant 0 : i32
    return %c0_i32, %c0_i32_0 : i32, i32
  }
  func.func @transform_3(%arg0: i32) -> (i32, i32) {
    %c0_i32 = arith.constant 0 : i32
    %c0_i32_0 = arith.constant 0 : i32
    %c0_i32_1 = arith.constant 0 : i32
    return %c0_i32, %c0_i32_0 : i32, i32
  }
  func.func @transform_4(%arg0: i32) -> (i32, i32) {
    %c0_i32 = arith.constant 0 : i32
    %c0_i32_0 = arith.constant 0 : i32
    %c0_i32_1 = arith.constant 0 : i32
    return %c0_i32, %c0_i32_0 : i32, i32
  }
  func.func @transform_5(%arg0: i32) -> (i32, i32) {
    %c0_i32 = arith.constant 0 : i32
    %c0_i32_0 = arith.constant 0 : i32
    return %arg0, %c0_i32 : i32, i32
  }
}

</mosaic_0001>

<bundles_post_ra>
// kernel: _lambda_.1
= control target key start
LH: loop header
LB: loop body
LE: loop exit
PB: predicated region body
PF: predicated region fallthrough
CT: control target
= control target key end

     0   :  { %vm93_vm0 = vcmask 130048   ;;  %vm1143_vm1 = vcmask 31744   ;;  %s2438_s1 = inlined_call_operand.vmem [shape: f32[16,128], index: 1, kind: input, shape index: {}]   ;;  %s2439_s0 = inlined_call_operand.vmem [shape: f32[512,16], index: 0, kind: input, shape index: {}]   ;;  %s2440_s3 = inlined_call_operand.vmem [shape: f32[128,4], index: 3, kind: input, shape index: {}]   ;;  %s2441_s2 = inlined_call_operand.vmem [shape: f32[1,128], index: 2, kind: input, shape index: {}]   ;;  %s2442_s4 = inlined_call_operand.vmem [shape: f32[1,4], index: 4, kind: input, shape index: {}]   ;;  %s2443_s5 = inlined_call_operand.vmem [shape: f32[512,4], index: 5, kind: output, shape index: {}]  }
   0x1   :  { %v84_v0 = vld [vmem:[%s2438_s1] sm:$0xff]  ;;  %v85_v1 = vld [vmem:[%s2438_s1 + $0x8] sm:$0xff]  ;;  %v22_v5 = vld [vmem:[%s2439_s0 + $0x10] sm:$0xff] }
   0x2   :  { %v20_v2 = vld [vmem:[%s2439_s0] sm:$0xff]  ;;  %v1652_v3 = vpack.c.bf16 %v85_v1, %v84_v0  ;;  %v21_v4 = vld [vmem:[%s2439_s0 + $0x8] sm:$0xff]  ;;  %v23_v6 = vld [vmem:[%s2439_s0 + $0x18] sm:$0xff] }
   0x3   :  { %1428 = vmatprep.mubr.msk.f32.mxu0 %vm93_vm0, %v20_v2  ;;  %v24_v7 = vld [vmem:[%s2439_s0 + $0x20] sm:$0xff]  ;;  %v25_v8 = vld [vmem:[%s2439_s0 + $0x28] sm:$0xff]  ;;  %v26_v9 = vld [vmem:[%s2439_s0 + $0x30] sm:$0xff] }
   0x4   :  { %1653 = vmatprep.subr.bf16.mxu0 %v1652_v3  ;;  %v27_v10 = vld [vmem:[%s2439_s0 + $0x38] sm:$0xff]  ;;  %v28_v11 = vld [vmem:[%s2439_s0 + $0x40] sm:$0xff]  ;;  %v29_v12 = vld [vmem:[%s2439_s0 + $0x48] sm:$0xff] }
   0x5   :  { %1655 = vmatpush3.bf16.msra.mxu0 %v1652_v3  ;;  %v30_v13 = vld [vmem:[%s2439_s0 + $0x50] sm:$0xff]  ;;  %v735_v14 = vld [vmem:[%s2440_s3] sm:$0xff]  ;;  %v736_v15 = vld [vmem:[%s2440_s3 + $0x8] sm:$0xff] }
   0x6   :  { %v737_v16 = vld [vmem:[%s2440_s3 + $0x10] sm:$0xff]  ;;  %v1656_v17 = vpack.c.bf16 %v736_v15, %v735_v14  ;;  %v738_v18 = vld [vmem:[%s2440_s3 + $0x18] sm:$0xff]  ;;  %v739_v21 = vld [vmem:[%s2440_s3 + $0x20] sm:$0xff] }
   0x7   :  { %v31_v19 = vld [vmem:[%s2439_s0 + $0x58] sm:$0xff]  ;;  %v1660_v20 = vpack.c.bf16 %v738_v18, %v737_v16  ;;  %v740_v22 = vld [vmem:[%s2440_s3 + $0x28] sm:$0xff]  ;;  %v32_v23 = vld [vmem:[%s2439_s0 + $0x60] sm:$0xff] }
   0x8   :  { %1429 = vmatmul.mubr.msk.f32.vlgmr.msra.gmra.mrb[0].mxu0 %vm93_vm0, %v21_v4  ;;  %1657 = vmatprep.subr.bf16.mxu0 %v1656_v17  ;;  %v1664_v24 = vpack.c.bf16 %v740_v22, %v739_v21  ;;  %v33_v25 = vld [vmem:[%s2439_s0 + $0x68] sm:$0xff]  ;;  %v741_v26 = vld [vmem:[%s2440_s3 + $0x30] sm:$0xff]  ;;  %v742_v27 = vld [vmem:[%s2440_s3 + $0x38] sm:$0xff] }
   0x9   :  { %1431 = vmatprep.mubr.msk.f32.mxu0 %vm93_vm0, %v22_v5  ;;  %1688 = vmatprep.subr.bf16.mxu1 %v1656_v17  ;;  %v34_v28 = vld [vmem:[%s2439_s0 + $0x70] sm:$0xff]  ;;  %v1668_v29 = vpack.c.bf16 %v742_v27, %v741_v26  ;;  %v35_v30 = vld [vmem:[%s2439_s0 + $0x78] sm:$0xff]  ;;  %v743_v31 = vld [vmem:[%s2440_s3 + $0x40] sm:$0xff] }
   0xa   :  { %1659 = vmatpush3.bf16.msra.mxu0 %v1656_v17  ;;  %1696 = vmatpush3.bf16.msra.mxu1 %v1656_v17  ;;  %v744_v32 = vld [vmem:[%s2440_s3 + $0x48] sm:$0xff]  ;;  %v36_v33 = vld [vmem:[%s2439_s0 + $0x80] sm:$0xff]  ;;  %v745_v36 = vld [vmem:[%s2440_s3 + $0x50] sm:$0xff] }
   0xb   :  { %1661 = vmatprep.subr.bf16.mxu0 %v1660_v20  ;;  %1689 = vmatprep.subr.bf16.mxu1 %v1660_v20  ;;  %v1672_v34 = vpack.c.bf16 %v744_v32, %v743_v31  ;;  %v37_v35 = vld [vmem:[%s2439_s0 + $0x88] sm:$0xff]  ;;  %v746_v37 = vld [vmem:[%s2440_s3 + $0x58] sm:$0xff]  ;;  %v38_v38 = vld [vmem:[%s2439_s0 + $0x90] sm:$0xff] }
   0xc   :  { %1432 = vmatmul.mubr.msk.f32.gmra.mrb[2].mxu0 %vm93_vm0, %v23_v6  ;;  %v1676_v39 = vpack.c.bf16 %v746_v37, %v745_v36  ;;  %v39_v40 = vld [vmem:[%s2439_s0 + $0x98] sm:$0xff]  ;;  %v747_v41 = vld [vmem:[%s2440_s3 + $0x60] sm:$0xff]  ;;  %v748_v42 = vld [vmem:[%s2440_s3 + $0x68] sm:$0xff] }
   0xd   :  { %1434 = vmatprep.mubr.msk.f32.mxu0 %vm93_vm0, %v24_v7  ;;  %v40_v43 = vld [vmem:[%s2439_s0 + $0xa0] sm:$0xff]  ;;  %v1680_v44 = vpack.c.bf16 %v748_v42, %v747_v41  ;;  %v41_v45 = vld [vmem:[%s2439_s0 + $0xa8] sm:$0xff]  ;;  %v42_v46 = vld [vmem:[%s2439_s0 + $0xb0] sm:$0xff] }
   0xe   :  { %1663 = vmatpush3.bf16.msra.mxu0 %v1660_v20  ;;  %1697 = vmatpush3.bf16.msra.mxu1 %v1660_v20  ;;  %v43_v47 = vld [vmem:[%s2439_s0 + $0xb8] sm:$0xff]  ;;  %v44_v48 = vld [vmem:[%s2439_s0 + $0xc0] sm:$0xff]  ;;  %v45_v49 = vld [vmem:[%s2439_s0 + $0xc8] sm:$0xff] }
   0xf   :  { %1665 = vmatprep.subr.bf16.mxu0 %v1664_v24  ;;  %1690 = vmatprep.subr.bf16.mxu1 %v1664_v24  ;;  %v46_v50 = vld [vmem:[%s2439_s0 + $0xd0] sm:$0xff]  ;;  %v47_v51 = vld [vmem:[%s2439_s0 + $0xd8] sm:$0xff]  ;;  %v48_v52 = vld [vmem:[%s2439_s0 + $0xe0] sm:$0xff] }
  0x10   :  { %1435 = vmatmul.mubr.msk.f32.gmra.mrb[4].mxu0 %vm93_vm0, %v25_v8  ;;  %v49_v53 = vld [vmem:[%s2439_s0 + $0xe8] sm:$0xff]  ;;  %v50_v54 = vld [vmem:[%s2439_s0 + $0xf0] sm:$0xff]  ;;  %v51_v55 = vld [vmem:[%s2439_s0 + $0xf8] sm:$0xff] }
  0x11   :  { %1437 = vmatprep.mubr.msk.f32.mxu0 %vm93_vm0, %v26_v9  ;;  %v52_v56 = vld [vmem:[%s2439_s0 + $0x100] sm:$0xff]  ;;  %v53_v57 = vld [vmem:[%s2439_s0 + $0x108] sm:$0xff]  ;;  %v54_v58 = vld [vmem:[%s2439_s0 + $0x110] sm:$0xff] }
  0x12   :  { %1667 = vmatpush3.bf16.msra.mxu0 %v1664_v24  ;;  %1698 = vmatpush3.bf16.msra.mxu1 %v1664_v24  ;;  %v55_v59 = vld [vmem:[%s2439_s0 + $0x118] sm:$0xff]  ;;  %v56_v60 = vld [vmem:[%s2439_s0 + $0x120] sm:$0xff]  ;;  %v57_v61 = vld [vmem:[%s2439_s0 + $0x128] sm:$0xff] }
  0x13   :  { %1669 = vmatprep.subr.bf16.mxu0 %v1668_v29  ;;  %1691 = vmatprep.subr.bf16.mxu1 %v1668_v29  ;;  %v58_v62 = vld [vmem:[%s2439_s0 + $0x130] sm:$0xff]  ;;  %v59_v63 = vld [vmem:[%s2439_s0 + $0x138] sm:$0xff]  ;;  %v60_v0 = vld [vmem:[%s2439_s0 + $0x140] sm:$0xff] }
  0x14   :  { %1438 = vmatmul.mubr.msk.f32.gmra.mrb[6].mxu0 %vm93_vm0, %v27_v10  ;;  %v61_v1 = vld [vmem:[%s2439_s0 + $0x148] sm:$0xff]  ;;  %v62_v2 = vld [vmem:[%s2439_s0 + $0x150] sm:$0xff]  ;;  %v63_v3 = vld [vmem:[%s2439_s0 + $0x158] sm:$0xff] }
  0x15   :  { %1440 = vmatprep.mubr.msk.f32.mxu0 %vm93_vm0, %v28_v11  ;;  %v64_v4 = vld [vmem:[%s2439_s0 + $0x160] sm:$0xff]  ;;  %v749_v5 = vld [vmem:[%s2440_s3 + $0x70] sm:$0xff]  ;;  %v750_v6 = vld [vmem:[%s2440_s3 + $0x78] sm:$0xff] }
  0x16   :  { %1671 = vmatpush3.bf16.msra.mxu0 %v1668_v29  ;;  %1699 = vmatpush3.bf16.msra.mxu1 %v1668_v29  ;;  %v1684_v7 = vpack.c.bf16 %v750_v6, %v749_v5  ;;  %v65_v8 = vld [vmem:[%s2439_s0 + $0x168] sm:$0xff]  ;;  %v66_v9 = vld [vmem:[%s2439_s0 + $0x170] sm:$0xff]  ;;  %v67_v10 = vld [vmem:[%s2439_s0 + $0x178] sm:$0xff] }
  0x17   :  { %1673 = vmatprep.subr.bf16.mxu0 %v1672_v34  ;;  %1692 = vmatprep.subr.bf16.mxu1 %v1672_v34  ;;  %v68_v11 = vld [vmem:[%s2439_s0 + $0x180] sm:$0xff]  ;;  %v71_v14 = vld [vmem:[%s2439_s0 + $0x198] sm:$0xff]  ;;  %v73_v16 = vld [vmem:[%s2439_s0 + $0x1a8] sm:$0xff] }
  0x18   :  { %1441 = vmatmul.mubr.msk.f32.gmra.mrb[8].mxu0 %vm93_vm0, %v29_v12  ;;  %v69_v12 = vld [vmem:[%s2439_s0 + $0x188] sm:$0xff]  ;;  %v72_v15 = vld [vmem:[%s2439_s0 + $0x1a0] sm:$0xff]  ;;  %v74_v17 = vld [vmem:[%s2439_s0 + $0x1b0] sm:$0xff] }
  0x19   :  { %1443 = vmatprep.mubr.msk.f32.mxu0 %vm93_vm0, %v30_v13  ;;  %v70_v13 = vld [vmem:[%s2439_s0 + $0x190] sm:$0xff]  ;;  %v75_v18 = vld [vmem:[%s2439_s0 + $0x1b8] sm:$0xff]  ;;  %v77_v20 = vld [vmem:[%s2439_s0 + $0x1c8] sm:$0xff] }
  0x1a   :  { %1675 = vmatpush3.bf16.msra.mxu0 %v1672_v34  ;;  %1700 = vmatpush3.bf16.msra.mxu1 %v1672_v34  ;;  %v78_v21 = vld [vmem:[%s2439_s0 + $0x1d0] sm:$0xff]  ;;  %v79_v22 = vld [vmem:[%s2439_s0 + $0x1d8] sm:$0xff]  ;;  %v81_v24 = vld [vmem:[%s2439_s0 + $0x1e8] sm:$0xff] }
  0x1b   :  { %1677 = vmatprep.subr.bf16.mxu0 %v1676_v39  ;;  %1693 = vmatprep.subr.bf16.mxu1 %v1676_v39  ;;  %v83_v26 = vld [vmem:[%s2439_s0 + $0x1f8] sm:$0xff]  ;;  %v2047_v27 = vld [vmem:[%s2441_s2] ss:$0 sm:$0xff] }
  0x1c   :  { %1444 = vmatmul.mubr.msk.f32.gmra.mrb[10].mxu0 %vm93_vm0, %v31_v19  ;;  %v76_v19 = vld [vmem:[%s2439_s0 + $0x1c0] sm:$0xff] }
  0x1d   :  { %1446 = vmatprep.mubr.msk.f32.mxu0 %vm93_vm0, %v32_v23  ;;  %v80_v23 = vld [vmem:[%s2439_s0 + $0x1e0] sm:$0xff] }
  0x1e   :  { %1679 = vmatpush3.bf16.msra.mxu0 %v1676_v39  ;;  %1701 = vmatpush3.bf16.msra.mxu1 %v1676_v39 }
  0x1f   :  { %1681 = vmatprep.subr.bf16.mxu0 %v1680_v44  ;;  %1694 = vmatprep.subr.bf16.mxu1 %v1680_v44 }
  0x20   :  { %1447 = vmatmul.mubr.msk.f32.gmra.mrb[12].mxu0 %vm93_vm0, %v33_v25  ;;  %v82_v25 = vld [vmem:[%s2439_s0 + $0x1f0] sm:$0xff] }
  0x21   :  { %1449 = vmatprep.mubr.msk.f32.mxu0 %vm93_vm0, %v34_v28 }
  0x22   :  { %1683 = vmatpush3.bf16.msra.mxu0 %v1680_v44  ;;  %1702 = vmatpush3.bf16.msra.mxu1 %v1680_v44 }
  0x23   :  { %1685 = vmatprep.subr.bf16.mxu0 %v1684_v7  ;;  %1695 = vmatprep.subr.bf16.mxu1 %v1684_v7 }
  0x24   :  { %1450 = vmatmul.mubr.msk.f32.gmra.mrb[14].mxu0 %vm93_vm0, %v35_v30 }
  0x25   :  { %1452 = vmatprep.mubr.msk.f32.mxu0 %vm93_vm0, %v36_v33 }
  0x26   :  { %1687 = vmatpush3.bf16.msra.mxu0 %v1684_v7  ;;  %1703 = vmatpush3.bf16.msra.mxu1 %v1684_v7 }
  0x28   :  { %1453 = vmatmul.mubr.msk.f32.gmra.mrb[16].mxu0 %vm93_vm0, %v37_v35 }
  0x29   :  { %1455 = vmatprep.mubr.msk.f32.mxu0 %vm93_vm0, %v38_v38 }
  0x2c   :  { %1456 = vmatmul.mubr.msk.f32.gmra.mrb[18].mxu0 %vm93_vm0, %v39_v40 }
  0x2d   :  { %1458 = vmatprep.mubr.msk.f32.mxu0 %vm93_vm0, %v40_v43 }
  0x30   :  { %1459 = vmatmul.mubr.msk.f32.gmra.mrb[20].mxu0 %vm93_vm0, %v41_v45 }
  0x31   :  { %1461 = vmatprep.mubr.msk.f32.mxu0 %vm93_vm0, %v42_v46 }
  0x34   :  { %1462 = vmatmul.mubr.msk.f32.gmra.mrb[22].mxu0 %vm93_vm0, %v43_v47 }
  0x35   :  { %1464 = vmatprep.mubr.msk.f32.mxu0 %vm93_vm0, %v44_v48 }
  0x38   :  { %1465 = vmatmul.mubr.msk.f32.gmra.mrb[24].mxu0 %vm93_vm0, %v45_v49 }
  0x39   :  { %1467 = vmatprep.mubr.msk.f32.mxu0 %vm93_vm0, %v46_v50 }
  0x3c   :  { %1468 = vmatmul.mubr.msk.f32.gmra.mrb[26].mxu0 %vm93_vm0, %v47_v51 }
  0x3d   :  { %1470 = vmatprep.mubr.msk.f32.mxu0 %vm93_vm0, %v48_v52 }
  0x40   :  { %1471 = vmatmul.mubr.msk.f32.gmra.mrb[28].mxu0 %vm93_vm0, %v49_v53 }
  0x41   :  { %1473 = vmatprep.mubr.msk.f32.mxu0 %vm93_vm0, %v50_v54 }
  0x44   :  { %1474 = vmatmul.mubr.msk.f32.gmra.mrb[30].mxu0 %vm93_vm0, %v51_v55 }
  0x45   :  { %1476 = vmatprep.mubr.msk.f32.mxu0 %vm93_vm0, %v52_v56 }
  0x48   :  { %1477 = vmatmul.mubr.msk.f32.gmra.mrb[32].mxu0 %vm93_vm0, %v53_v57 }
  0x49   :  { %1479 = vmatprep.mubr.msk.f32.mxu0 %vm93_vm0, %v54_v58 }
  0x4c   :  { %1480 = vmatmul.mubr.msk.f32.gmra.mrb[34].mxu0 %vm93_vm0, %v55_v59 }
  0x4d   :  { %1482 = vmatprep.mubr.msk.f32.mxu0 %vm93_vm0, %v56_v60 }
  0x50   :  { %1483 = vmatmul.mubr.msk.f32.gmra.mrb[36].mxu0 %vm93_vm0, %v57_v61 }
  0x51   :  { %1485 = vmatprep.mubr.msk.f32.mxu0 %vm93_vm0, %v58_v62 }
  0x54   :  { %1486 = vmatmul.mubr.msk.f32.gmra.mrb[38].mxu0 %vm93_vm0, %v59_v63 }
  0x55   :  { %1488 = vmatprep.mubr.msk.f32.mxu0 %vm93_vm0, %v60_v0 }
  0x58   :  { %1489 = vmatmul.mubr.msk.f32.gmra.mrb[40].mxu0 %vm93_vm0, %v61_v1 }
  0x59   :  { %1491 = vmatprep.mubr.msk.f32.mxu0 %vm93_vm0, %v62_v2 }
  0x5c   :  { %1492 = vmatmul.mubr.msk.f32.gmra.mrb[42].mxu0 %vm93_vm0, %v63_v3 }
  0x5d   :  { %1494 = vmatprep.mubr.msk.f32.mxu0 %vm93_vm0, %v64_v4 }
  0x60   :  { %1495 = vmatmul.mubr.msk.f32.gmra.mrb[44].mxu0 %vm93_vm0, %v65_v8 }
  0x61   :  { %1497 = vmatprep.mubr.msk.f32.mxu0 %vm93_vm0, %v66_v9 }
  0x64   :  { %1498 = vmatmul.mubr.msk.f32.gmra.mrb[46].mxu0 %vm93_vm0, %v67_v10 }
  0x65   :  { %1500 = vmatprep.mubr.msk.f32.mxu0 %vm93_vm0, %v68_v11 }
  0x68   :  { %1501 = vmatmul.mubr.msk.f32.gmra.mrb[48].mxu0 %vm93_vm0, %v69_v12 }
  0x69   :  { %1503 = vmatprep.mubr.msk.f32.mxu0 %vm93_vm0, %v70_v13 }
  0x6c   :  { %1504 = vmatmul.mubr.msk.f32.gmra.mrb[50].mxu0 %vm93_vm0, %v71_v14 }
  0x6d   :  { %1506 = vmatprep.mubr.msk.f32.mxu0 %vm93_vm0, %v72_v15 }
  0x70   :  { %1507 = vmatmul.mubr.msk.f32.gmra.mrb[52].mxu0 %vm93_vm0, %v73_v16 }
  0x71   :  { %1509 = vmatprep.mubr.msk.f32.mxu0 %vm93_vm0, %v74_v17 }
  0x74   :  { %1510 = vmatmul.mubr.msk.f32.gmra.mrb[54].mxu0 %vm93_vm0, %v75_v18 }
  0x75   :  { %1512 = vmatprep.mubr.msk.f32.mxu0 %vm93_vm0, %v76_v19 }
  0x78   :  { %1513 = vmatmul.mubr.msk.f32.gmra.mrb[56].mxu0 %vm93_vm0, %v77_v20 }
  0x79   :  { %1515 = vmatprep.mubr.msk.f32.mxu0 %vm93_vm0, %v78_v21 }
  0x7c   :  { %1516 = vmatmul.mubr.msk.f32.gmra.mrb[58].mxu0 %vm93_vm0, %v79_v22 }
  0x7d   :  { %1518 = vmatprep.mubr.msk.f32.mxu0 %vm93_vm0, %v80_v23 }
  0x80   :  { %1519 = vmatmul.mubr.msk.f32.gmra.mrb[60].mxu0 %vm93_vm0, %v81_v24 }
  0x81   :  { %1521 = vmatprep.mubr.msk.f32.mxu0 %vm93_vm0, %v82_v25 }
  0x84   :  { %1522 = vmatmul.mubr.msk.f32.gmra.mrb[62].mxu0 %vm93_vm0, %v83_v26 }
  0xdb   :  { %v1430_v28 = vpop.f32.mrb[0].mxu0 }
  0xdc   :  { %v358_v29 = vadd.f32 %v1430_v28, %v2047_v27  ;;  %v352_v30 = vpop.f32.mrb[1].mxu0 }
  0xdd   :  { %v353_v31 = vadd.f32 %v2047_v27, %v352_v30 }
  0xde   :  { %v672_v34 = vmax.f32 %v358_v29, 0.0 }
  0xdf   :  { %v671_v32 = vmax.f32 %v353_v31, 0.0  ;;  %v1433_v33 = vpop.f32.mrb[2].mxu0 }
  0xe0   :  { %v368_v35 = vadd.f32 %v1433_v33, %v2047_v27  ;;  %v362_v36 = vpop.f32.mrb[3].mxu0 }
  0xe1   :  { %v363_v37 = vadd.f32 %v2047_v27, %v362_v36  ;;  %1556 = vmatprep.mubr.f32.mxu0 %v671_v32 }
  0xe2   :  { %1557 = vmatmul.mubr.f32.vlgmr.msra.gmra.mrb[64].mxu0 %v672_v34  ;;  %v674_v40 = vmax.f32 %v368_v35, 0.0 }
  0xe3   :  { %v673_v38 = vmax.f32 %v363_v37, 0.0  ;;  %v1436_v39 = vpop.f32.mrb[4].mxu0 }
  0xe4   :  { %v378_v41 = vadd.f32 %v1436_v39, %v2047_v27  ;;  %v372_v42 = vpop.f32.mrb[5].mxu0 }
  0xe5   :  { %v373_v43 = vadd.f32 %v2047_v27, %v372_v42  ;;  %1559 = vmatprep.mubr.f32.mxu0 %v673_v38 }
  0xe6   :  { %1560 = vmatmul.mubr.f32.gmra.mrb[66].mxu0 %v674_v40  ;;  %v676_v46 = vmax.f32 %v378_v41, 0.0 }
  0xe7   :  { %v675_v44 = vmax.f32 %v373_v43, 0.0  ;;  %v1439_v45 = vpop.f32.mrb[6].mxu0 }
  0xe8   :  { %v388_v47 = vadd.f32 %v1439_v45, %v2047_v27  ;;  %v382_v48 = vpop.f32.mrb[7].mxu0 }
  0xe9   :  { %1562 = vmatprep.mubr.f32.mxu0 %v675_v44  ;;  %v383_v49 = vadd.f32 %v2047_v27, %v382_v48 }
  0xea   :  { %1563 = vmatmul.mubr.f32.gmra.mrb[68].mxu0 %v676_v46  ;;  %v678_v52 = vmax.f32 %v388_v47, 0.0 }
  0xeb   :  { %v1442_v50 = vpop.f32.mrb[8].mxu0  ;;  %v677_v51 = vmax.f32 %v383_v49, 0.0 }
  0xec   :  { %v398_v53 = vadd.f32 %v1442_v50, %v2047_v27  ;;  %v392_v54 = vpop.f32.mrb[9].mxu0 }
  0xed   :  { %v393_v55 = vadd.f32 %v2047_v27, %v392_v54  ;;  %1565 = vmatprep.mubr.f32.mxu1 %v677_v51 }
  0xee   :  { %1566 = vmatmul.mubr.f32.vlgmr.msra.gmra.mrb[0].mxu1 %v678_v52  ;;  %v680_v58 = vmax.f32 %v398_v53, 0.0 }
  0xef   :  { %v679_v56 = vmax.f32 %v393_v55, 0.0  ;;  %v1445_v57 = vpop.f32.mrb[10].mxu0 }
  0xf0   :  { %v408_v59 = vadd.f32 %v1445_v57, %v2047_v27  ;;  %v402_v60 = vpop.f32.mrb[11].mxu0 }
  0xf1   :  { %v403_v61 = vadd.f32 %v2047_v27, %v402_v60  ;;  %1568 = vmatprep.mubr.f32.mxu1 %v679_v56 }
  0xf2   :  { %1569 = vmatmul.mubr.f32.gmra.mrb[2].mxu1 %v680_v58  ;;  %v682_v0 = vmax.f32 %v408_v59, 0.0 }
  0xf3   :  { %v681_v62 = vmax.f32 %v403_v61, 0.0  ;;  %v1448_v63 = vpop.f32.mrb[12].mxu0 }
  0xf4   :  { %v418_v1 = vadd.f32 %v1448_v63, %v2047_v27  ;;  %v412_v2 = vpop.f32.mrb[13].mxu0 }
  0xf5   :  { %v413_v3 = vadd.f32 %v2047_v27, %v412_v2  ;;  %1571 = vmatprep.mubr.f32.mxu1 %v681_v62 }
  0xf6   :  { %1572 = vmatmul.mubr.f32.gmra.mrb[4].mxu1 %v682_v0  ;;  %v684_v6 = vmax.f32 %v418_v1, 0.0 }
  0xf7   :  { %v683_v4 = vmax.f32 %v413_v3, 0.0  ;;  %v1451_v5 = vpop.f32.mrb[14].mxu0 }
  0xf8   :  { %v428_v7 = vadd.f32 %v1451_v5, %v2047_v27  ;;  %v422_v8 = vpop.f32.mrb[15].mxu0 }
  0xf9   :  { %v423_v9 = vadd.f32 %v2047_v27, %v422_v8  ;;  %1574 = vmatprep.mubr.f32.mxu1 %v683_v4 }
  0xfa   :  { %1575 = vmatmul.mubr.f32.gmra.mrb[6].mxu1 %v684_v6  ;;  %v686_v12 = vmax.f32 %v428_v7, 0.0 }
  0xfb   :  { %v685_v10 = vmax.f32 %v423_v9, 0.0  ;;  %v1454_v11 = vpop.f32.mrb[16].mxu0 }
  0xfc   :  { %v438_v13 = vadd.f32 %v1454_v11, %v2047_v27  ;;  %v432_v14 = vpop.f32.mrb[17].mxu0 }
  0xfd   :  { %v433_v15 = vadd.f32 %v2047_v27, %v432_v14  ;;  %1577 = vmatprep.mubr.f32.mxu1 %v685_v10 }
  0xfe   :  { %1578 = vmatmul.mubr.f32.gmra.mrb[8].mxu1 %v686_v12  ;;  %v688_v18 = vmax.f32 %v438_v13, 0.0 }
  0xff   :  { %v687_v16 = vmax.f32 %v433_v15, 0.0  ;;  %v1457_v17 = vpop.f32.mrb[18].mxu0 }
 0x100   :  { %v448_v19 = vadd.f32 %v1457_v17, %v2047_v27  ;;  %v442_v20 = vpop.f32.mrb[19].mxu0 }
 0x101   :  { %v443_v21 = vadd.f32 %v2047_v27, %v442_v20  ;;  %1580 = vmatprep.mubr.f32.mxu1 %v687_v16 }
 0x102   :  { %1581 = vmatmul.mubr.f32.gmra.mrb[10].mxu1 %v688_v18  ;;  %v690_v24 = vmax.f32 %v448_v19, 0.0 }
 0x103   :  { %v689_v22 = vmax.f32 %v443_v21, 0.0  ;;  %v1460_v23 = vpop.f32.mrb[20].mxu0 }
 0x104   :  { %v458_v25 = vadd.f32 %v1460_v23, %v2047_v27  ;;  %v452_v26 = vpop.f32.mrb[21].mxu0 }
 0x105   :  { %v453_v28 = vadd.f32 %v2047_v27, %v452_v26  ;;  %1583 = vmatprep.mubr.f32.mxu1 %v689_v22 }
 0x106   :  { %1584 = vmatmul.mubr.f32.gmra.mrb[12].mxu1 %v690_v24  ;;  %v692_v31 = vmax.f32 %v458_v25, 0.0 }
 0x107   :  { %v691_v29 = vmax.f32 %v453_v28, 0.0  ;;  %v1463_v30 = vpop.f32.mrb[22].mxu0 }
 0x108   :  { %v468_v32 = vadd.f32 %v1463_v30, %v2047_v27  ;;  %v462_v33 = vpop.f32.mrb[23].mxu0 }
 0x109   :  { %v463_v34 = vadd.f32 %v2047_v27, %v462_v33  ;;  %1586 = vmatprep.mubr.f32.mxu1 %v691_v29 }
 0x10a   :  { %1587 = vmatmul.mubr.f32.gmra.mrb[14].mxu1 %v692_v31  ;;  %v694_v37 = vmax.f32 %v468_v32, 0.0 }
 0x10b   :  { %v693_v35 = vmax.f32 %v463_v34, 0.0  ;;  %v1466_v36 = vpop.f32.mrb[24].mxu0 }
 0x10c   :  { %v478_v38 = vadd.f32 %v1466_v36, %v2047_v27  ;;  %v472_v39 = vpop.f32.mrb[25].mxu0 }
 0x10d   :  { %v473_v40 = vadd.f32 %v2047_v27, %v472_v39  ;;  %1589 = vmatprep.mubr.f32.mxu1 %v693_v35 }
 0x10e   :  { %1590 = vmatmul.mubr.f32.gmra.mrb[16].mxu1 %v694_v37  ;;  %v696_v43 = vmax.f32 %v478_v38, 0.0 }
 0x10f   :  { %v695_v41 = vmax.f32 %v473_v40, 0.0  ;;  %v1469_v42 = vpop.f32.mrb[26].mxu0 }
 0x110   :  { %v488_v44 = vadd.f32 %v1469_v42, %v2047_v27  ;;  %v482_v45 = vpop.f32.mrb[27].mxu0 }
 0x111   :  { %v483_v46 = vadd.f32 %v2047_v27, %v482_v45  ;;  %1592 = vmatprep.mubr.f32.mxu1 %v695_v41 }
 0x112   :  { %1593 = vmatmul.mubr.f32.gmra.mrb[18].mxu1 %v696_v43  ;;  %v698_v49 = vmax.f32 %v488_v44, 0.0 }
 0x113   :  { %v697_v47 = vmax.f32 %v483_v46, 0.0  ;;  %v1472_v48 = vpop.f32.mrb[28].mxu0 }
 0x114   :  { %v498_v50 = vadd.f32 %v1472_v48, %v2047_v27  ;;  %v492_v51 = vpop.f32.mrb[29].mxu0 }
 0x115   :  { %v493_v52 = vadd.f32 %v2047_v27, %v492_v51  ;;  %1595 = vmatprep.mubr.f32.mxu1 %v697_v47 }
 0x116   :  { %1596 = vmatmul.mubr.f32.gmra.mrb[20].mxu1 %v698_v49  ;;  %v700_v55 = vmax.f32 %v498_v50, 0.0 }
 0x117   :  { %v699_v53 = vmax.f32 %v493_v52, 0.0  ;;  %v1475_v54 = vpop.f32.mrb[30].mxu0 }
 0x118   :  { %v508_v56 = vadd.f32 %v1475_v54, %v2047_v27  ;;  %v502_v57 = vpop.f32.mrb[31].mxu0 }
 0x119   :  { %v503_v58 = vadd.f32 %v2047_v27, %v502_v57  ;;  %1598 = vmatprep.mubr.f32.mxu1 %v699_v53 }
 0x11a   :  { %1599 = vmatmul.mubr.f32.gmra.mrb[22].mxu1 %v700_v55  ;;  %v702_v61 = vmax.f32 %v508_v56, 0.0 }
 0x11b   :  { %v701_v59 = vmax.f32 %v503_v58, 0.0  ;;  %v1478_v60 = vpop.f32.mrb[32].mxu0 }
 0x11c   :  { %v518_v62 = vadd.f32 %v1478_v60, %v2047_v27  ;;  %v512_v63 = vpop.f32.mrb[33].mxu0 }
 0x11d   :  { %v513_v0 = vadd.f32 %v2047_v27, %v512_v63  ;;  %1601 = vmatprep.mubr.f32.mxu1 %v701_v59 }
 0x11e   :  { %1602 = vmatmul.mubr.f32.gmra.mrb[24].mxu1 %v702_v61  ;;  %v704_v3 = vmax.f32 %v518_v62, 0.0 }
 0x11f   :  { %v703_v1 = vmax.f32 %v513_v0, 0.0  ;;  %v1481_v2 = vpop.f32.mrb[34].mxu0 }
 0x120   :  { %v528_v4 = vadd.f32 %v1481_v2, %v2047_v27  ;;  %v522_v5 = vpop.f32.mrb[35].mxu0 }
 0x121   :  { %v523_v6 = vadd.f32 %v2047_v27, %v522_v5  ;;  %1604 = vmatprep.mubr.f32.mxu1 %v703_v1 }
 0x122   :  { %1605 = vmatmul.mubr.f32.gmra.mrb[26].mxu1 %v704_v3  ;;  %v706_v9 = vmax.f32 %v528_v4, 0.0 }
 0x123   :  { %v705_v7 = vmax.f32 %v523_v6, 0.0  ;;  %v1484_v8 = vpop.f32.mrb[36].mxu0 }
 0x124   :  { %v538_v10 = vadd.f32 %v1484_v8, %v2047_v27  ;;  %v532_v11 = vpop.f32.mrb[37].mxu0 }
 0x125   :  { %v533_v12 = vadd.f32 %v2047_v27, %v532_v11  ;;  %1607 = vmatprep.mubr.f32.mxu1 %v705_v7 }
 0x126   :  { %1608 = vmatmul.mubr.f32.gmra.mrb[28].mxu1 %v706_v9  ;;  %v708_v15 = vmax.f32 %v538_v10, 0.0 }
 0x127   :  { %v707_v13 = vmax.f32 %v533_v12, 0.0  ;;  %v1487_v14 = vpop.f32.mrb[38].mxu0 }
 0x128   :  { %v548_v16 = vadd.f32 %v1487_v14, %v2047_v27  ;;  %v542_v17 = vpop.f32.mrb[39].mxu0 }
 0x129   :  { %v543_v18 = vadd.f32 %v2047_v27, %v542_v17  ;;  %1610 = vmatprep.mubr.f32.mxu1 %v707_v13 }
 0x12a   :  { %1611 = vmatmul.mubr.f32.gmra.mrb[30].mxu1 %v708_v15  ;;  %v710_v21 = vmax.f32 %v548_v16, 0.0 }
 0x12b   :  { %v709_v19 = vmax.f32 %v543_v18, 0.0  ;;  %v1490_v20 = vpop.f32.mrb[40].mxu0 }
 0x12c   :  { %v558_v22 = vadd.f32 %v1490_v20, %v2047_v27  ;;  %v552_v23 = vpop.f32.mrb[41].mxu0 }
 0x12d   :  { %v553_v24 = vadd.f32 %v2047_v27, %v552_v23  ;;  %1613 = vmatprep.mubr.f32.mxu1 %v709_v19 }
 0x12e   :  { %1614 = vmatmul.mubr.f32.gmra.mrb[32].mxu1 %v710_v21  ;;  %v712_v28 = vmax.f32 %v558_v22, 0.0 }
 0x12f   :  { %v711_v25 = vmax.f32 %v553_v24, 0.0  ;;  %v1493_v26 = vpop.f32.mrb[42].mxu0 }
 0x130   :  { %v568_v29 = vadd.f32 %v1493_v26, %v2047_v27  ;;  %v562_v30 = vpop.f32.mrb[43].mxu0 }
 0x131   :  { %v563_v31 = vadd.f32 %v2047_v27, %v562_v30  ;;  %1616 = vmatprep.mubr.f32.mxu1 %v711_v25 }
 0x132   :  { %1617 = vmatmul.mubr.f32.gmra.mrb[34].mxu1 %v712_v28  ;;  %v714_v34 = vmax.f32 %v568_v29, 0.0 }
 0x133   :  { %v713_v32 = vmax.f32 %v563_v31, 0.0  ;;  %v1496_v33 = vpop.f32.mrb[44].mxu0  ;;  %v2116_v31 = vld [vmem:[%s2442_s4] ss:$0 sm:$0xff] }
 0x134   :  { %v578_v35 = vadd.f32 %v1496_v33, %v2047_v27  ;;  %v572_v36 = vpop.f32.mrb[45].mxu0 }
 0x135   :  { %v573_v37 = vadd.f32 %v2047_v27, %v572_v36  ;;  %1619 = vmatprep.mubr.f32.mxu1 %v713_v32 }
 0x136   :  { %1620 = vmatmul.mubr.f32.gmra.mrb[36].mxu1 %v714_v34  ;;  %v716_v40 = vmax.f32 %v578_v35, 0.0 }
 0x137   :  { %v715_v38 = vmax.f32 %v573_v37, 0.0  ;;  %v1499_v39 = vpop.f32.mrb[46].mxu0 }
 0x138   :  { %v588_v41 = vadd.f32 %v1499_v39, %v2047_v27  ;;  %v582_v42 = vpop.f32.mrb[47].mxu0 }
 0x139   :  { %v583_v43 = vadd.f32 %v2047_v27, %v582_v42  ;;  %1622 = vmatprep.mubr.f32.mxu1 %v715_v38 }
 0x13a   :  { %1623 = vmatmul.mubr.f32.gmra.mrb[38].mxu1 %v716_v40  ;;  %v718_v46 = vmax.f32 %v588_v41, 0.0 }
 0x13b   :  { %v717_v44 = vmax.f32 %v583_v43, 0.0  ;;  %v1502_v45 = vpop.f32.mrb[48].mxu0 }
 0x13c   :  { %v598_v47 = vadd.f32 %v1502_v45, %v2047_v27  ;;  %v592_v48 = vpop.f32.mrb[49].mxu0 }
 0x13d   :  { %v593_v49 = vadd.f32 %v2047_v27, %v592_v48  ;;  %1625 = vmatprep.mubr.f32.mxu1 %v717_v44 }
 0x13e   :  { %1626 = vmatmul.mubr.f32.gmra.mrb[40].mxu1 %v718_v46  ;;  %v720_v52 = vmax.f32 %v598_v47, 0.0 }
 0x13f   :  { %v719_v50 = vmax.f32 %v593_v49, 0.0  ;;  %v1505_v51 = vpop.f32.mrb[50].mxu0 }
 0x140   :  { %v608_v53 = vadd.f32 %v1505_v51, %v2047_v27  ;;  %v602_v54 = vpop.f32.mrb[51].mxu0 }
 0x141   :  { %v603_v55 = vadd.f32 %v2047_v27, %v602_v54  ;;  %1628 = vmatprep.mubr.f32.mxu1 %v719_v50 }
 0x142   :  { %1629 = vmatmul.mubr.f32.gmra.mrb[42].mxu1 %v720_v52  ;;  %v722_v58 = vmax.f32 %v608_v53, 0.0 }
 0x143   :  { %v721_v56 = vmax.f32 %v603_v55, 0.0  ;;  %v1508_v57 = vpop.f32.mrb[52].mxu0 }
 0x144   :  { %v618_v59 = vadd.f32 %v1508_v57, %v2047_v27  ;;  %v612_v60 = vpop.f32.mrb[53].mxu0 }
 0x145   :  { %v613_v61 = vadd.f32 %v2047_v27, %v612_v60  ;;  %1631 = vmatprep.mubr.f32.mxu1 %v721_v56 }
 0x146   :  { %1632 = vmatmul.mubr.f32.gmra.mrb[44].mxu1 %v722_v58  ;;  %v724_v0 = vmax.f32 %v618_v59, 0.0 }
 0x147   :  { %v723_v62 = vmax.f32 %v613_v61, 0.0  ;;  %v1511_v63 = vpop.f32.mrb[54].mxu0 }
 0x148   :  { %v628_v1 = vadd.f32 %v1511_v63, %v2047_v27  ;;  %v622_v2 = vpop.f32.mrb[55].mxu0 }
 0x149   :  { %v623_v3 = vadd.f32 %v2047_v27, %v622_v2  ;;  %1634 = vmatprep.mubr.f32.mxu1 %v723_v62 }
 0x14a   :  { %1635 = vmatmul.mubr.f32.gmra.mrb[46].mxu1 %v724_v0  ;;  %v726_v6 = vmax.f32 %v628_v1, 0.0 }
 0x14b   :  { %v725_v4 = vmax.f32 %v623_v3, 0.0  ;;  %v1514_v5 = vpop.f32.mrb[56].mxu0 }
 0x14c   :  { %v638_v7 = vadd.f32 %v1514_v5, %v2047_v27  ;;  %v632_v8 = vpop.f32.mrb[57].mxu0 }
 0x14d   :  { %v633_v9 = vadd.f32 %v2047_v27, %v632_v8  ;;  %1637 = vmatprep.mubr.f32.mxu1 %v725_v4 }
 0x14e   :  { %1638 = vmatmul.mubr.f32.gmra.mrb[48].mxu1 %v726_v6  ;;  %v728_v12 = vmax.f32 %v638_v7, 0.0 }
 0x14f   :  { %v727_v10 = vmax.f32 %v633_v9, 0.0  ;;  %v1517_v11 = vpop.f32.mrb[58].mxu0 }
 0x150   :  { %v648_v13 = vadd.f32 %v1517_v11, %v2047_v27  ;;  %v642_v14 = vpop.f32.mrb[59].mxu0 }
 0x151   :  { %v643_v15 = vadd.f32 %v2047_v27, %v642_v14  ;;  %1640 = vmatprep.mubr.f32.mxu1 %v727_v10 }
 0x152   :  { %1641 = vmatmul.mubr.f32.gmra.mrb[50].mxu1 %v728_v12  ;;  %v730_v18 = vmax.f32 %v648_v13, 0.0 }
 0x153   :  { %v729_v16 = vmax.f32 %v643_v15, 0.0  ;;  %v1520_v17 = vpop.f32.mrb[60].mxu0 }
 0x154   :  { %v658_v19 = vadd.f32 %v1520_v17, %v2047_v27  ;;  %v652_v20 = vpop.f32.mrb[61].mxu0 }
 0x155   :  { %v653_v21 = vadd.f32 %v2047_v27, %v652_v20  ;;  %1643 = vmatprep.mubr.f32.mxu1 %v729_v16 }
 0x156   :  { %1644 = vmatmul.mubr.f32.gmra.mrb[52].mxu1 %v730_v18  ;;  %v732_v24 = vmax.f32 %v658_v19, 0.0 }
 0x157   :  { %v731_v22 = vmax.f32 %v653_v21, 0.0  ;;  %v1523_v23 = vpop.f32.mrb[62].mxu0 }
 0x158   :  { %v668_v25 = vadd.f32 %v1523_v23, %v2047_v27  ;;  %v662_v26 = vpop.f32.mrb[63].mxu0 }
 0x159   :  { %v663_v28 = vadd.f32 %v2047_v27, %v662_v26  ;;  %1646 = vmatprep.mubr.f32.mxu1 %v731_v22 }
 0x15a   :  { %1647 = vmatmul.mubr.f32.gmra.mrb[54].mxu1 %v732_v24  ;;  %v734_v30 = vmax.f32 %v668_v25, 0.0 }
 0x15b   :  { %v733_v29 = vmax.f32 %v663_v28, 0.0 }
 0x15d   :  { %1649 = vmatprep.mubr.f32.mxu1 %v733_v29 }
 0x15e   :  { %1650 = vmatmul.mubr.f32.gmra.mrb[56].mxu1 %v734_v30 }
 0x1b5   :  { %v1558_v32 = vpop.f32.mrb[64].mxu0 }
 0x1b6   :  { %v830_v33 = vadd.f32 %v1558_v32, %v2116_v31  ;;  %v824_v34 = vpop.f32.mrb[65].mxu0 }
 0x1b7   :  { %v825_v35 = vadd.f32 %v2116_v31, %v824_v34 }
 0x1b8   :  { %1145 = vst.msk [vmem:[%s2443_s5 + $0x8] sm:$0xff] %vm1143_vm1, %v830_v33 }
 0x1b9   :  { %1144 = vst.msk [vmem:[%s2443_s5] sm:$0xff] %vm1143_vm1, %v825_v35  ;;  %v1561_v27 = vpop.f32.mrb[66].mxu0 }
 0x1ba   :  { %v840_v36 = vadd.f32 %v1561_v27, %v2116_v31  ;;  %v834_v37 = vpop.f32.mrb[67].mxu0 }
 0x1bb   :  { %v835_v38 = vadd.f32 %v2116_v31, %v834_v37 }
 0x1bc   :  { %1147 = vst.msk [vmem:[%s2443_s5 + $0x18] sm:$0xff] %vm1143_vm1, %v840_v36 }
 0x1bd   :  { %1146 = vst.msk [vmem:[%s2443_s5 + $0x10] sm:$0xff] %vm1143_vm1, %v835_v38  ;;  %v1564_v39 = vpop.f32.mrb[68].mxu0 }
 0x1be   :  { %v850_v40 = vadd.f32 %v1564_v39, %v2116_v31  ;;  %v844_v41 = vpop.f32.mrb[69].mxu0 }
 0x1bf   :  { %v845_v42 = vadd.f32 %v2116_v31, %v844_v41 }
 0x1c0   :  { %1149 = vst.msk [vmem:[%s2443_s5 + $0x28] sm:$0xff] %vm1143_vm1, %v850_v40 }
 0x1c1   :  { %1148 = vst.msk [vmem:[%s2443_s5 + $0x20] sm:$0xff] %vm1143_vm1, %v845_v42  ;;  %v1567_v43 = vpop.f32.mrb[0].mxu1 }
 0x1c2   :  { %v860_v44 = vadd.f32 %v1567_v43, %v2116_v31  ;;  %v854_v45 = vpop.f32.mrb[1].mxu1 }
 0x1c3   :  { %v855_v46 = vadd.f32 %v2116_v31, %v854_v45 }
 0x1c4   :  { %1151 = vst.msk [vmem:[%s2443_s5 + $0x38] sm:$0xff] %vm1143_vm1, %v860_v44 }
 0x1c5   :  { %1150 = vst.msk [vmem:[%s2443_s5 + $0x30] sm:$0xff] %vm1143_vm1, %v855_v46  ;;  %v1570_v47 = vpop.f32.mrb[2].mxu1 }
 0x1c6   :  { %v870_v48 = vadd.f32 %v1570_v47, %v2116_v31  ;;  %v864_v49 = vpop.f32.mrb[3].mxu1 }
 0x1c7   :  { %v865_v50 = vadd.f32 %v2116_v31, %v864_v49 }
 0x1c8   :  { %1153 = vst.msk [vmem:[%s2443_s5 + $0x48] sm:$0xff] %vm1143_vm1, %v870_v48 }
 0x1c9   :  { %1152 = vst.msk [vmem:[%s2443_s5 + $0x40] sm:$0xff] %vm1143_vm1, %v865_v50  ;;  %v1573_v51 = vpop.f32.mrb[4].mxu1 }
 0x1ca   :  { %v880_v52 = vadd.f32 %v1573_v51, %v2116_v31  ;;  %v874_v53 = vpop.f32.mrb[5].mxu1 }
 0x1cb   :  { %v875_v54 = vadd.f32 %v2116_v31, %v874_v53 }
 0x1cc   :  { %1155 = vst.msk [vmem:[%s2443_s5 + $0x58] sm:$0xff] %vm1143_vm1, %v880_v52 }
 0x1cd   :  { %1154 = vst.msk [vmem:[%s2443_s5 + $0x50] sm:$0xff] %vm1143_vm1, %v875_v54  ;;  %v1576_v55 = vpop.f32.mrb[6].mxu1 }
 0x1ce   :  { %v890_v56 = vadd.f32 %v1576_v55, %v2116_v31  ;;  %v884_v57 = vpop.f32.mrb[7].mxu1 }
 0x1cf   :  { %v885_v58 = vadd.f32 %v2116_v31, %v884_v57 }
 0x1d0   :  { %1157 = vst.msk [vmem:[%s2443_s5 + $0x68] sm:$0xff] %vm1143_vm1, %v890_v56 }
 0x1d1   :  { %1156 = vst.msk [vmem:[%s2443_s5 + $0x60] sm:$0xff] %vm1143_vm1, %v885_v58  ;;  %v1579_v59 = vpop.f32.mrb[8].mxu1 }
 0x1d2   :  { %v900_v60 = vadd.f32 %v1579_v59, %v2116_v31  ;;  %v894_v61 = vpop.f32.mrb[9].mxu1 }
 0x1d3   :  { %v895_v62 = vadd.f32 %v2116_v31, %v894_v61 }
 0x1d4   :  { %1159 = vst.msk [vmem:[%s2443_s5 + $0x78] sm:$0xff] %vm1143_vm1, %v900_v60 }
 0x1d5   :  { %1158 = vst.msk [vmem:[%s2443_s5 + $0x70] sm:$0xff] %vm1143_vm1, %v895_v62  ;;  %v1582_v63 = vpop.f32.mrb[10].mxu1 }
 0x1d6   :  { %v910_v0 = vadd.f32 %v1582_v63, %v2116_v31  ;;  %v904_v1 = vpop.f32.mrb[11].mxu1 }
 0x1d7   :  { %v905_v2 = vadd.f32 %v2116_v31, %v904_v1 }
 0x1d8   :  { %1161 = vst.msk [vmem:[%s2443_s5 + $0x88] sm:$0xff] %vm1143_vm1, %v910_v0 }
 0x1d9   :  { %1160 = vst.msk [vmem:[%s2443_s5 + $0x80] sm:$0xff] %vm1143_vm1, %v905_v2  ;;  %v1585_v3 = vpop.f32.mrb[12].mxu1 }
 0x1da   :  { %v920_v4 = vadd.f32 %v1585_v3, %v2116_v31  ;;  %v914_v5 = vpop.f32.mrb[13].mxu1 }
 0x1db   :  { %v915_v6 = vadd.f32 %v2116_v31, %v914_v5 }
 0x1dc   :  { %1163 = vst.msk [vmem:[%s2443_s5 + $0x98] sm:$0xff] %vm1143_vm1, %v920_v4 }
 0x1dd   :  { %1162 = vst.msk [vmem:[%s2443_s5 + $0x90] sm:$0xff] %vm1143_vm1, %v915_v6  ;;  %v1588_v7 = vpop.f32.mrb[14].mxu1 }
 0x1de   :  { %v930_v8 = vadd.f32 %v1588_v7, %v2116_v31  ;;  %v924_v9 = vpop.f32.mrb[15].mxu1 }
 0x1df   :  { %v925_v10 = vadd.f32 %v2116_v31, %v924_v9 }
 0x1e0   :  { %1165 = vst.msk [vmem:[%s2443_s5 + $0xa8] sm:$0xff] %vm1143_vm1, %v930_v8 }
 0x1e1   :  { %1164 = vst.msk [vmem:[%s2443_s5 + $0xa0] sm:$0xff] %vm1143_vm1, %v925_v10  ;;  %v1591_v11 = vpop.f32.mrb[16].mxu1 }
 0x1e2   :  { %v940_v12 = vadd.f32 %v1591_v11, %v2116_v31  ;;  %v934_v13 = vpop.f32.mrb[17].mxu1 }
 0x1e3   :  { %v935_v14 = vadd.f32 %v2116_v31, %v934_v13 }
 0x1e4   :  { %1167 = vst.msk [vmem:[%s2443_s5 + $0xb8] sm:$0xff] %vm1143_vm1, %v940_v12 }
 0x1e5   :  { %1166 = vst.msk [vmem:[%s2443_s5 + $0xb0] sm:$0xff] %vm1143_vm1, %v935_v14  ;;  %v1594_v15 = vpop.f32.mrb[18].mxu1 }
 0x1e6   :  { %v950_v16 = vadd.f32 %v1594_v15, %v2116_v31  ;;  %v944_v17 = vpop.f32.mrb[19].mxu1 }
 0x1e7   :  { %v945_v18 = vadd.f32 %v2116_v31, %v944_v17 }
 0x1e8   :  { %1169 = vst.msk [vmem:[%s2443_s5 + $0xc8] sm:$0xff] %vm1143_vm1, %v950_v16 }
 0x1e9   :  { %1168 = vst.msk [vmem:[%s2443_s5 + $0xc0] sm:$0xff] %vm1143_vm1, %v945_v18  ;;  %v1597_v19 = vpop.f32.mrb[20].mxu1 }
 0x1ea   :  { %v960_v20 = vadd.f32 %v1597_v19, %v2116_v31  ;;  %v954_v21 = vpop.f32.mrb[21].mxu1 }
 0x1eb   :  { %v955_v22 = vadd.f32 %v2116_v31, %v954_v21 }
 0x1ec   :  { %1171 = vst.msk [vmem:[%s2443_s5 + $0xd8] sm:$0xff] %vm1143_vm1, %v960_v20 }
 0x1ed   :  { %1170 = vst.msk [vmem:[%s2443_s5 + $0xd0] sm:$0xff] %vm1143_vm1, %v955_v22  ;;  %v1600_v23 = vpop.f32.mrb[22].mxu1 }
 0x1ee   :  { %v970_v24 = vadd.f32 %v1600_v23, %v2116_v31  ;;  %v964_v25 = vpop.f32.mrb[23].mxu1 }
 0x1ef   :  { %v965_v26 = vadd.f32 %v2116_v31, %v964_v25 }
 0x1f0   :  { %1173 = vst.msk [vmem:[%s2443_s5 + $0xe8] sm:$0xff] %vm1143_vm1, %v970_v24 }
 0x1f1   :  { %1172 = vst.msk [vmem:[%s2443_s5 + $0xe0] sm:$0xff] %vm1143_vm1, %v965_v26  ;;  %v1603_v28 = vpop.f32.mrb[24].mxu1 }
 0x1f2   :  { %v980_v29 = vadd.f32 %v1603_v28, %v2116_v31  ;;  %v974_v30 = vpop.f32.mrb[25].mxu1 }
 0x1f3   :  { %v975_v32 = vadd.f32 %v2116_v31, %v974_v30 }
 0x1f4   :  { %1175 = vst.msk [vmem:[%s2443_s5 + $0xf8] sm:$0xff] %vm1143_vm1, %v980_v29 }
 0x1f5   :  { %1174 = vst.msk [vmem:[%s2443_s5 + $0xf0] sm:$0xff] %vm1143_vm1, %v975_v32  ;;  %v1606_v33 = vpop.f32.mrb[26].mxu1 }
 0x1f6   :  { %v990_v34 = vadd.f32 %v1606_v33, %v2116_v31  ;;  %v984_v35 = vpop.f32.mrb[27].mxu1 }
 0x1f7   :  { %v985_v27 = vadd.f32 %v2116_v31, %v984_v35 }
 0x1f8   :  { %1177 = vst.msk [vmem:[%s2443_s5 + $0x108] sm:$0xff] %vm1143_vm1, %v990_v34 }
 0x1f9   :  { %1176 = vst.msk [vmem:[%s2443_s5 + $0x100] sm:$0xff] %vm1143_vm1, %v985_v27  ;;  %v1609_v36 = vpop.f32.mrb[28].mxu1 }
 0x1fa   :  { %v1000_v37 = vadd.f32 %v1609_v36, %v2116_v31  ;;  %v994_v38 = vpop.f32.mrb[29].mxu1 }
 0x1fb   :  { %v995_v39 = vadd.f32 %v2116_v31, %v994_v38 }
 0x1fc   :  { %1179 = vst.msk [vmem:[%s2443_s5 + $0x118] sm:$0xff] %vm1143_vm1, %v1000_v37 }
 0x1fd   :  { %1178 = vst.msk [vmem:[%s2443_s5 + $0x110] sm:$0xff] %vm1143_vm1, %v995_v39  ;;  %v1612_v40 = vpop.f32.mrb[30].mxu1 }
 0x1fe   :  { %v1010_v41 = vadd.f32 %v1612_v40, %v2116_v31  ;;  %v1004_v42 = vpop.f32.mrb[31].mxu1 }
 0x1ff   :  { %v1005_v43 = vadd.f32 %v2116_v31, %v1004_v42 }
 0x200   :  { %1181 = vst.msk [vmem:[%s2443_s5 + $0x128] sm:$0xff] %vm1143_vm1, %v1010_v41 }
 0x201   :  { %1180 = vst.msk [vmem:[%s2443_s5 + $0x120] sm:$0xff] %vm1143_vm1, %v1005_v43  ;;  %v1615_v44 = vpop.f32.mrb[32].mxu1 }
 0x202   :  { %v1020_v45 = vadd.f32 %v1615_v44, %v2116_v31  ;;  %v1014_v46 = vpop.f32.mrb[33].mxu1 }
 0x203   :  { %v1015_v47 = vadd.f32 %v2116_v31, %v1014_v46 }
 0x204   :  { %1183 = vst.msk [vmem:[%s2443_s5 + $0x138] sm:$0xff] %vm1143_vm1, %v1020_v45 }
 0x205   :  { %1182 = vst.msk [vmem:[%s2443_s5 + $0x130] sm:$0xff] %vm1143_vm1, %v1015_v47  ;;  %v1618_v48 = vpop.f32.mrb[34].mxu1 }
 0x206   :  { %v1030_v49 = vadd.f32 %v1618_v48, %v2116_v31  ;;  %v1024_v50 = vpop.f32.mrb[35].mxu1 }
 0x207   :  { %v1025_v51 = vadd.f32 %v2116_v31, %v1024_v50 }
 0x208   :  { %1185 = vst.msk [vmem:[%s2443_s5 + $0x148] sm:$0xff] %vm1143_vm1, %v1030_v49 }
 0x209   :  { %1184 = vst.msk [vmem:[%s2443_s5 + $0x140] sm:$0xff] %vm1143_vm1, %v1025_v51  ;;  %v1621_v52 = vpop.f32.mrb[36].mxu1 }
 0x20a   :  { %v1040_v53 = vadd.f32 %v1621_v52, %v2116_v31  ;;  %v1034_v54 = vpop.f32.mrb[37].mxu1 }
 0x20b   :  { %v1035_v55 = vadd.f32 %v2116_v31, %v1034_v54 }
 0x20c   :  { %1187 = vst.msk [vmem:[%s2443_s5 + $0x158] sm:$0xff] %vm1143_vm1, %v1040_v53 }
 0x20d   :  { %1186 = vst.msk [vmem:[%s2443_s5 + $0x150] sm:$0xff] %vm1143_vm1, %v1035_v55  ;;  %v1624_v56 = vpop.f32.mrb[38].mxu1 }
 0x20e   :  { %v1050_v57 = vadd.f32 %v1624_v56, %v2116_v31  ;;  %v1044_v58 = vpop.f32.mrb[39].mxu1 }
 0x20f   :  { %v1045_v59 = vadd.f32 %v2116_v31, %v1044_v58 }
 0x210   :  { %1189 = vst.msk [vmem:[%s2443_s5 + $0x168] sm:$0xff] %vm1143_vm1, %v1050_v57 }
 0x211   :  { %1188 = vst.msk [vmem:[%s2443_s5 + $0x160] sm:$0xff] %vm1143_vm1, %v1045_v59  ;;  %v1627_v60 = vpop.f32.mrb[40].mxu1 }
 0x212   :  { %v1060_v61 = vadd.f32 %v1627_v60, %v2116_v31  ;;  %v1054_v62 = vpop.f32.mrb[41].mxu1 }
 0x213   :  { %v1055_v63 = vadd.f32 %v2116_v31, %v1054_v62 }
 0x214   :  { %1191 = vst.msk [vmem:[%s2443_s5 + $0x178] sm:$0xff] %vm1143_vm1, %v1060_v61 }
 0x215   :  { %1190 = vst.msk [vmem:[%s2443_s5 + $0x170] sm:$0xff] %vm1143_vm1, %v1055_v63  ;;  %v1630_v0 = vpop.f32.mrb[42].mxu1 }
 0x216   :  { %v1070_v1 = vadd.f32 %v1630_v0, %v2116_v31  ;;  %v1064_v2 = vpop.f32.mrb[43].mxu1 }
 0x217   :  { %v1065_v3 = vadd.f32 %v2116_v31, %v1064_v2 }
 0x218   :  { %1193 = vst.msk [vmem:[%s2443_s5 + $0x188] sm:$0xff] %vm1143_vm1, %v1070_v1 }
 0x219   :  { %1192 = vst.msk [vmem:[%s2443_s5 + $0x180] sm:$0xff] %vm1143_vm1, %v1065_v3  ;;  %v1633_v4 = vpop.f32.mrb[44].mxu1 }
 0x21a   :  { %v1080_v5 = vadd.f32 %v1633_v4, %v2116_v31  ;;  %v1074_v6 = vpop.f32.mrb[45].mxu1 }
 0x21b   :  { %v1075_v7 = vadd.f32 %v2116_v31, %v1074_v6 }
 0x21c   :  { %1195 = vst.msk [vmem:[%s2443_s5 + $0x198] sm:$0xff] %vm1143_vm1, %v1080_v5 }
 0x21d   :  { %1194 = vst.msk [vmem:[%s2443_s5 + $0x190] sm:$0xff] %vm1143_vm1, %v1075_v7  ;;  %v1636_v8 = vpop.f32.mrb[46].mxu1 }
 0x21e   :  { %v1090_v9 = vadd.f32 %v1636_v8, %v2116_v31  ;;  %v1084_v10 = vpop.f32.mrb[47].mxu1 }
 0x21f   :  { %v1085_v11 = vadd.f32 %v2116_v31, %v1084_v10 }
 0x220   :  { %1197 = vst.msk [vmem:[%s2443_s5 + $0x1a8] sm:$0xff] %vm1143_vm1, %v1090_v9 }
 0x221   :  { %1196 = vst.msk [vmem:[%s2443_s5 + $0x1a0] sm:$0xff] %vm1143_vm1, %v1085_v11  ;;  %v1639_v12 = vpop.f32.mrb[48].mxu1 }
 0x222   :  { %v1100_v13 = vadd.f32 %v1639_v12, %v2116_v31  ;;  %v1094_v14 = vpop.f32.mrb[49].mxu1 }
 0x223   :  { %v1095_v15 = vadd.f32 %v2116_v31, %v1094_v14 }
 0x224   :  { %1199 = vst.msk [vmem:[%s2443_s5 + $0x1b8] sm:$0xff] %vm1143_vm1, %v1100_v13 }
 0x225   :  { %1198 = vst.msk [vmem:[%s2443_s5 + $0x1b0] sm:$0xff] %vm1143_vm1, %v1095_v15  ;;  %v1642_v16 = vpop.f32.mrb[50].mxu1 }
 0x226   :  { %v1110_v17 = vadd.f32 %v1642_v16, %v2116_v31  ;;  %v1104_v18 = vpop.f32.mrb[51].mxu1 }
 0x227   :  { %v1105_v19 = vadd.f32 %v2116_v31, %v1104_v18 }
 0x228   :  { %1201 = vst.msk [vmem:[%s2443_s5 + $0x1c8] sm:$0xff] %vm1143_vm1, %v1110_v17 }
 0x229   :  { %1200 = vst.msk [vmem:[%s2443_s5 + $0x1c0] sm:$0xff] %vm1143_vm1, %v1105_v19  ;;  %v1645_v20 = vpop.f32.mrb[52].mxu1 }
 0x22a   :  { %v1120_v21 = vadd.f32 %v1645_v20, %v2116_v31  ;;  %v1114_v22 = vpop.f32.mrb[53].mxu1 }
 0x22b   :  { %v1115_v23 = vadd.f32 %v2116_v31, %v1114_v22 }
 0x22c   :  { %1203 = vst.msk [vmem:[%s2443_s5 + $0x1d8] sm:$0xff] %vm1143_vm1, %v1120_v21 }
 0x22d   :  { %1202 = vst.msk [vmem:[%s2443_s5 + $0x1d0] sm:$0xff] %vm1143_vm1, %v1115_v23  ;;  %v1648_v24 = vpop.f32.mrb[54].mxu1 }
 0x22e   :  { %v1130_v25 = vadd.f32 %v1648_v24, %v2116_v31  ;;  %v1124_v26 = vpop.f32.mrb[55].mxu1 }
 0x22f   :  { %v1125_v28 = vadd.f32 %v2116_v31, %v1124_v26 }
 0x230   :  { %1205 = vst.msk [vmem:[%s2443_s5 + $0x1e8] sm:$0xff] %vm1143_vm1, %v1130_v25 }
 0x231   :  { %1204 = vst.msk [vmem:[%s2443_s5 + $0x1e0] sm:$0xff] %vm1143_vm1, %v1125_v28  ;;  %v1651_v29 = vpop.f32.mrb[56].mxu1 }
 0x232   :  { %v1140_v30 = vadd.f32 %v1651_v29, %v2116_v31  ;;  %v1134_v32 = vpop.f32.mrb[57].mxu1 }
 0x233   :  { %v1135_v33 = vadd.f32 %v2116_v31, %v1134_v32 }
 0x234   :  { %1207 = vst.msk [vmem:[%s2443_s5 + $0x1f8] sm:$0xff] %vm1143_vm1, %v1140_v30 }
 0x235   :  { %1206 = vst.msk [vmem:[%s2443_s5 + $0x1f0] sm:$0xff] %vm1143_vm1, %v1135_v33 }

</bundles_post_ra>
